<compile_context>
chip_gen: v7x
topology: tpu7x:2x2x1
jax: 0.10.0
libtpu: 0.0.40
codegen_flags: <defaults>
</compile_context>

<pallas_src>
import functools

import jax
import jax.numpy as jnp
from jax.experimental import pallas as pl
from jax.experimental.pallas import tpu as pltpu


LANE = 128        # vreg lane width
SUB = 8           # vreg sublane count
SPLIT_ROWS = 64   # batches above this get >= 2 grid steps (v7x megacore)


def _round_up(x: int, m: int) -> int:
    return (x + m - 1) // m * m


def _make_kernel(n_layers: int):
    """Kernel for an MLP with `n_layers` Linear layers (ReLU between)."""

    def kernel(*refs):
        # refs = [x, w1, b1, ..., wN, bN, mags, means, out]
        x_ref = refs[0]
        wb = refs[1:1 + 2 * n_layers]
        mags_ref = refs[1 + 2 * n_layers]
        means_ref = refs[2 + 2 * n_layers]
        out_ref = refs[3 + 2 * n_layers]
        a_dim = out_ref.shape[-1]

        h = x_ref[...]
        for l in range(n_layers):
            w = wb[2 * l][...]
            b = wb[2 * l + 1][...]
            h = jnp.dot(h, w, preferred_element_type=jnp.float32) + b
            if l < n_layers - 1:            # ReLU on hidden layers only
                h = jnp.maximum(h, 0.0)
        # Last layer's weight/bias are zero-padded on the lane axis; keep only
        # the real action columns for the epilogue and the narrow store.
        a = h[:, :a_dim]
        out_ref[...] = jnp.tanh(a) * mags_ref[...] + means_ref[...]

    return kernel


def prepare_params(params):
    """One-time packing (call OUTSIDE the jitted forward).

    Hidden/output widths of the weights are zero-padded to 128-lane multiples
    (weights are VMEM-resident across the grid, so the padding is free at run
    time); the state dim and the streamed mags/means/output stay unpadded.
    Zero padding is mathematically inert.
    """
    n_layers = sum(1 for k in params if k.startswith("w"))
    dims = [params["w1"].shape[0]] + [params[f"w{i + 1}"].shape[1]
                                      for i in range(n_layers)]
    pdims = [dims[0]] + [_round_up(d, LANE) for d in dims[1:]]

    packed = {}
    for l in range(n_layers):
        w = jnp.asarray(params[f"w{l + 1}"], jnp.float32)
        b = jnp.asarray(params[f"b{l + 1}"], jnp.float32).reshape(1, -1)
        din, dout = w.shape
        packed[f"w{l + 1}"] = (jnp.zeros((pdims[l], pdims[l + 1]), jnp.float32)
                               .at[:din, :dout].set(w))
        packed[f"b{l + 1}"] = (jnp.zeros((1, pdims[l + 1]), jnp.float32)
                               .at[:, :dout].set(b))
    packed["mags"] = jnp.asarray(params["mags"], jnp.float32).reshape(1, -1)
    packed["means"] = jnp.asarray(params["means"], jnp.float32).reshape(1, -1)
    return packed


@functools.partial(jax.jit, static_argnames=("tm_max",))
def actor_network_det(state, packed, *, tm_max: int = 4096):
    """state: (B, state_dim) f32.  packed: output of prepare_params()."""
    n_layers = sum(1 for k in packed if k.startswith("w"))
    B, S = state.shape
    pdims = [S] + [packed[f"w{i + 1}"].shape[1] for i in range(n_layers)]
    action_dim = packed["mags"].shape[-1]

    # ---- batch tiling (tm always a multiple of 8) -------------------------
    tm_max = max(SUB, (int(tm_max) // SUB) * SUB)
    rows = _round_up(B, SUB)
    if rows <= SPLIT_ROWS:
        target = rows                                   # tiny/latency-bound
    else:
        target = _round_up((rows + 1) // 2, SUB)        # >= 2 steps for v7x
    tm = min(tm_max, target)
    b_pad = _round_up(B, tm)
    grid = (b_pad // tm,)

    x = state.astype(jnp.float32)
    if b_pad != B:                       # batch (sublane) padding only
        x = jnp.pad(x, ((0, b_pad - B), (0, 0)))

    args = [x]
    # Streamed input keeps its true width S (block spans full last dim).
    in_specs = [pl.BlockSpec((tm, S), lambda i: (i, 0))]
    for l in range(n_layers):
        w = packed[f"w{l + 1}"]
        b = packed[f"b{l + 1}"]
        args += [w, b]
        # Constant block index -> weights/biases stay VMEM-resident.
        in_specs += [
            pl.BlockSpec(w.shape, lambda i: (0, 0)),
            pl.BlockSpec(b.shape, lambda i: (0, 0)),
        ]
    args += [packed["mags"], packed["means"]]
    in_specs += [
        pl.BlockSpec((1, action_dim), lambda i: (0, 0)),
        pl.BlockSpec((1, action_dim), lambda i: (0, 0)),
    ]

    # Cost hint for XLA's scheduler (streamed tensors are now unpadded).
    flops = 2 * b_pad * sum(pdims[l] * pdims[l + 1] for l in range(n_layers))
    bytes_accessed = 4 * (
        b_pad * S + b_pad * action_dim
        + sum(pdims[l] * pdims[l + 1] + pdims[l + 1] for l in range(n_layers))
        + 2 * action_dim)
    cost = pl.CostEstimate(flops=flops,
                           transcendentals=b_pad * action_dim,
                           bytes_accessed=bytes_accessed)

    out = pl.pallas_call(
        _make_kernel(n_layers),
        out_shape=jax.ShapeDtypeStruct((b_pad, action_dim), jnp.float32),
        grid_spec=pltpu.PrefetchScalarGridSpec(
            num_scalar_prefetch=0,
            grid=grid,
            in_specs=in_specs,
            out_specs=pl.BlockSpec((tm, action_dim), lambda i: (i, 0)),
        ),
        compiler_params=pltpu.CompilerParams(
            dimension_semantics=("parallel",)),   # megacore sharding on v7x
        cost_estimate=cost,
    )(*args)

    return out[:B] if b_pad != B else out


def init_params(key, state_dim, hidden_sizes, action_dim, action_low, action_high):
    """Deterministic synthetic init (PyTorch-Linear-like uniform fan_in init)."""
    dims = [state_dim] + list(hidden_sizes) + [action_dim]
    keys = jax.random.split(key, 2 * (len(dims) - 1))
    params = {}
    for i, (din, dout) in enumerate(zip(dims[:-1], dims[1:])):
        bound = 1.0 / jnp.sqrt(jnp.float32(din))
        w = jax.random.uniform(keys[2 * i], (din, dout), jnp.float32, -bound, bound)
        b = jax.random.uniform(keys[2 * i + 1], (1, dout), jnp.float32, -bound, bound)
        params[f"w{i + 1}"] = w
        params[f"b{i + 1}"] = b
    params["means"] = ((action_high + action_low) / 2.0).reshape(1, action_dim)
    params["mags"] = ((action_high - action_low) / 2.0).reshape(1, action_dim)
    return params


def reference_forward(state, params):
    n_layers = sum(1 for k in params if k.startswith("w"))
    h = state
    for l in range(n_layers):
        h = h @ params[f"w{l + 1}"] + params[f"b{l + 1}"]
        if l < n_layers - 1:
            h = jnp.maximum(h, 0.0)
    return jnp.tanh(h) * params["mags"] + params["means"]


if __name__ == "__main__":
    key = jax.random.PRNGKey(0)
    k_state, k_params, k_state2 = jax.random.split(key, 3)

    # Small shapes consistent with the module: observation_space (16,),
    # fc_layer_params=(32, 32), action_space (4,) with bounds [-2, 2].
    batch = 8
    state_dim = 16
    hidden_sizes = (32, 32)
    action_dim = 4
    action_low = jnp.full((action_dim,), -2.0, jnp.float32)
    action_high = jnp.full((action_dim,), 2.0, jnp.float32)

    params = init_params(k_params, state_dim, hidden_sizes, action_dim,
                         action_low, action_high)
    packed = prepare_params(params)          # one-time packing, outside jit
    state = jax.random.normal(k_state, (batch, state_dim), jnp.float32)

    out = jax.block_until_ready(actor_network_det(state, packed))
    ref = reference_forward(state, params)
    assert out.shape == (batch, action_dim)
    assert jnp.allclose(out, ref, atol=1e-5, rtol=1e-5)

    # Secondary check: non-multiple batch, multiple grid steps
    # (exercises batch padding + the parallel grid path).
    batch2 = 136
    state2 = jax.random.normal(k_state2, (batch2, state_dim), jnp.float32)
    out2 = jax.block_until_ready(actor_network_det(state2, packed, tm_max=64))
    ref2 = reference_forward(state2, params)
    assert out2.shape == (batch2, action_dim)
    assert jnp.allclose(out2, ref2, atol=1e-5, rtol=1e-5)

    print("KERNEL_OK")
</pallas_src>

<mosaic_0001>
module attributes {stable_mosaic.version = 11 : i64} {
  func.func @kernel(%arg0: i32, %arg1: memref<8x16xf32, #tpu.memory_space<vmem>>, %arg2: memref<16x128xf32, #tpu.memory_space<vmem>>, %arg3: memref<1x128xf32, #tpu.memory_space<vmem>>, %arg4: memref<128x128xf32, #tpu.memory_space<vmem>>, %arg5: memref<1x128xf32, #tpu.memory_space<vmem>>, %arg6: memref<128x128xf32, #tpu.memory_space<vmem>>, %arg7: memref<1x128xf32, #tpu.memory_space<vmem>>, %arg8: memref<1x4xf32, #tpu.memory_space<vmem>>, %arg9: memref<1x4xf32, #tpu.memory_space<vmem>>, %arg10: memref<8x4xf32, #tpu.memory_space<vmem>>) attributes {dimension_semantics = [#tpu.dimension_semantics<parallel>], iteration_bounds = array<i64: 1>, scalar_prefetch = 0 : i64, scratch_operands = 0 : i64, tpu.core_type = #tpu.core_type<tc>, window_params = [{transform_indices = @transform_0, window_bounds = array<i64: 8, 16>}, {pipeline_mode = #tpu.pipeline_mode<synchronous>, transform_indices = @transform_1, window_bounds = array<i64: 16, 128>}, {pipeline_mode = #tpu.pipeline_mode<synchronous>, transform_indices = @transform_2, window_bounds = array<i64: 1, 128>}, {pipeline_mode = #tpu.pipeline_mode<synchronous>, transform_indices = @transform_3, window_bounds = array<i64: 128, 128>}, {pipeline_mode = #tpu.pipeline_mode<synchronous>, transform_indices = @transform_4, window_bounds = array<i64: 1, 128>}, {pipeline_mode = #tpu.pipeline_mode<synchronous>, transform_indices = @transform_5, window_bounds = array<i64: 128, 128>}, {pipeline_mode = #tpu.pipeline_mode<synchronous>, transform_indices = @transform_6, window_bounds = array<i64: 1, 128>}, {pipeline_mode = #tpu.pipeline_mode<synchronous>, transform_indices = @transform_7, window_bounds = array<i64: 1, 4>}, {pipeline_mode = #tpu.pipeline_mode<synchronous>, transform_indices = @transform_8, window_bounds = array<i64: 1, 4>}, {transform_indices = @transform_9, window_bounds = array<i64: 8, 4>}]} {
    %c0 = arith.constant 0 : index
    %c0_0 = arith.constant 0 : index
    %0 = vector.load %arg1[%c0, %c0_0] : memref<8x16xf32, #tpu.memory_space<vmem>>, vector<8x16xf32>
    %c0_1 = arith.constant 0 : index
    %c0_2 = arith.constant 0 : index
    %1 = vector.load %arg2[%c0_1, %c0_2] : memref<16x128xf32, #tpu.memory_space<vmem>>, vector<16x128xf32>
    %c0_3 = arith.constant 0 : index
    %c0_4 = arith.constant 0 : index
    %2 = vector.load %arg3[%c0_3, %c0_4] : memref<1x128xf32, #tpu.memory_space<vmem>>, vector<1x128xf32>
    %cst = arith.constant dense<0.000000e+00> : vector<8x128xf32>
    %3 = tpu.matmul %0, %1, %cst {dimension_numbers = #tpu.dot_dimension_numbers<[1], [0], [0], [1], [0, 0, 1, 1], [], []>} : vector<8x16xf32>, vector<16x128xf32>, vector<8x128xf32> -> vector<8x128xf32>
    %4 = vector.broadcast %2 : vector<1x128xf32> to vector<8x128xf32>
    %5 = arith.addf %3, %4 : vector<8x128xf32>
    %cst_5 = arith.constant 0.000000e+00 : f32
    %6 = vector.broadcast %cst_5 : f32 to vector<8x128xf32>
    %7 = arith.maximumf %5, %6 : vector<8x128xf32>
    %c0_6 = arith.constant 0 : index
    %c0_7 = arith.constant 0 : index
    %8 = vector.load %arg4[%c0_6, %c0_7] : memref<128x128xf32, #tpu.memory_space<vmem>>, vector<128x128xf32>
    %c0_8 = arith.constant 0 : index
    %c0_9 = arith.constant 0 : index
    %9 = vector.load %arg5[%c0_8, %c0_9] : memref<1x128xf32, #tpu.memory_space<vmem>>, vector<1x128xf32>
    %cst_10 = arith.constant dense<0.000000e+00> : vector<8x128xf32>
    %10 = tpu.matmul %7, %8, %cst_10 {dimension_numbers = #tpu.dot_dimension_numbers<[1], [0], [0], [1], [0, 0, 1, 1], [], []>} : vector<8x128xf32>, vector<128x128xf32>, vector<8x128xf32> -> vector<8x128xf32>
    %11 = vector.broadcast %9 : vector<1x128xf32> to vector<8x128xf32>
    %12 = arith.addf %10, %11 : vector<8x128xf32>
    %cst_11 = arith.constant 0.000000e+00 : f32
    %13 = vector.broadcast %cst_11 : f32 to vector<8x128xf32>
    %14 = arith.maximumf %12, %13 : vector<8x128xf32>
    %c0_12 = arith.constant 0 : index
    %c0_13 = arith.constant 0 : index
    %15 = vector.load %arg6[%c0_12, %c0_13] : memref<128x128xf32, #tpu.memory_space<vmem>>, vector<128x128xf32>
    %c0_14 = arith.constant 0 : index
    %c0_15 = arith.constant 0 : index
    %16 = vector.load %arg7[%c0_14, %c0_15] : memref<1x128xf32, #tpu.memory_space<vmem>>, vector<1x128xf32>
    %cst_16 = arith.constant dense<0.000000e+00> : vector<8x128xf32>
    %17 = tpu.matmul %14, %15, %cst_16 {dimension_numbers = #tpu.dot_dimension_numbers<[1], [0], [0], [1], [0, 0, 1, 1], [], []>} : vector<8x128xf32>, vector<128x128xf32>, vector<8x128xf32> -> vector<8x128xf32>
    %18 = vector.broadcast %16 : vector<1x128xf32> to vector<8x128xf32>
    %19 = arith.addf %17, %18 : vector<8x128xf32>
    %20 = vector.extract_strided_slice %19 {offsets = [0, 0], sizes = [8, 4], strides = [1, 1]} : vector<8x128xf32> to vector<8x4xf32>
    %21 = math.tanh %20 : vector<8x4xf32>
    %c0_17 = arith.constant 0 : index
    %c0_18 = arith.constant 0 : index
    %22 = vector.load %arg8[%c0_17, %c0_18] : memref<1x4xf32, #tpu.memory_space<vmem>>, vector<1x4xf32>
    %23 = vector.broadcast %22 : vector<1x4xf32> to vector<8x4xf32>
    %24 = arith.mulf %21, %23 : vector<8x4xf32>
    %c0_19 = arith.constant 0 : index
    %c0_20 = arith.constant 0 : index
    %25 = vector.load %arg9[%c0_19, %c0_20] : memref<1x4xf32, #tpu.memory_space<vmem>>, vector<1x4xf32>
    %26 = vector.broadcast %25 : vector<1x4xf32> to vector<8x4xf32>
    %27 = arith.addf %24, %26 : vector<8x4xf32>
    %c0_21 = arith.constant 0 : index
    %c0_22 = arith.constant 0 : index
    %28 = vector.load %arg10[%c0_21, %c0_22] : memref<8x4xf32, #tpu.memory_space<vmem>>, vector<8x4xf32>
    tpu.vector_store %arg10[%c0_21, %c0_22], %27 {strides = array<i32>} : memref<8x4xf32, #tpu.memory_space<vmem>>, vector<8x4xf32>,
    return
  }
  func.func @transform_0(%arg0: i32) -> (i32, i32) {
    %c0_i32 = arith.constant 0 : i32
    %c0_i32_0 = arith.constant 0 : i32
    return %arg0, %c0_i32 : i32, i32
  }
  func.func @transform_1(%arg0: i32) -> (i32, i32) {
    %c0_i32 = arith.constant 0 : i32
    %c0_i32_0 = arith.constant 0 : i32
    %c0_i32_1 = arith.constant 0 : i32
    return %c0_i32, %c0_i32_0 : i32, i32
  }
  func.func @transform_2(%arg0: i32) -> (i32, i32) {
    %c0_i32 = arith.constant 0 : i32
    %c0_i32_0 = arith.constant 0 : i32
    %c0_i32_1 = arith.constant 0 : i32
    return %c0_i32, %c0_i32_0 : i32, i32
  }
  func.func @transform_3(%arg0: i32) -> (i32, i32) {
    %c0_i32 = arith.constant 0 : i32
    %c0_i32_0 = arith.constant 0 : i32
    %c0_i32_1 = arith.constant 0 : i32
    return %c0_i32, %c0_i32_0 : i32, i32
  }
  func.func @transform_4(%arg0: i32) -> (i32, i32) {
    %c0_i32 = arith.constant 0 : i32
    %c0_i32_0 = arith.constant 0 : i32
    %c0_i32_1 = arith.constant 0 : i32
    return %c0_i32, %c0_i32_0 : i32, i32
  }
  func.func @transform_5(%arg0: i32) -> (i32, i32) {
    %c0_i32 = arith.constant 0 : i32
    %c0_i32_0 = arith.constant 0 : i32
    %c0_i32_1 = arith.constant 0 : i32
    return %c0_i32, %c0_i32_0 : i32, i32
  }
  func.func @transform_6(%arg0: i32) -> (i32, i32) {
    %c0_i32 = arith.constant 0 : i32
    %c0_i32_0 = arith.constant 0 : i32
    %c0_i32_1 = arith.constant 0 : i32
    return %c0_i32, %c0_i32_0 : i32, i32
  }
  func.func @transform_7(%arg0: i32) -> (i32, i32) {
    %c0_i32 = arith.constant 0 : i32
    %c0_i32_0 = arith.constant 0 : i32
    %c0_i32_1 = arith.constant 0 : i32
    return %c0_i32, %c0_i32_0 : i32, i32
  }
  func.func @transform_8(%arg0: i32) -> (i32, i32) {
    %c0_i32 = arith.constant 0 : i32
    %c0_i32_0 = arith.constant 0 : i32
    %c0_i32_1 = arith.constant 0 : i32
    return %c0_i32, %c0_i32_0 : i32, i32
  }
  func.func @transform_9(%arg0: i32) -> (i32, i32) {
    %c0_i32 = arith.constant 0 : i32
    %c0_i32_0 = arith.constant 0 : i32
    return %arg0, %c0_i32 : i32, i32
  }
}

</mosaic_0001>

<bundles_post_ra>
// kernel: actor_network_det.1
= control target key start
LH: loop header
LB: loop body
LE: loop exit
PB: predicated region body
PF: predicated region fallthrough
CT: control target
= control target key end

     0   :  { %14 = vsyncpa [#allocation3], 0  ;;  %s763_s0 = inlined_call_operand.hbm [shape: f32[8,16], index: 0, kind: input, shape index: {}]   ;;  %s764_s1 = inlined_call_operand.vmem [shape: f32[16,128], index: 1, kind: input, shape index: {}]   ;;  %s765_s2 = inlined_call_operand.vmem [shape: f32[1,128], index: 2, kind: input, shape index: {}]   ;;  %s766_s3 = inlined_call_operand.hbm [shape: f32[128,128], index: 3, kind: input, shape index: {}]   ;;  %s767_s4 = inlined_call_operand.vmem [shape: f32[1,128], index: 4, kind: input, shape index: {}]   ;;  %s768_s5 = inlined_call_operand.hbm [shape: f32[128,128], index: 5, kind: input, shape index: {}]   ;;  %s769_s6 = inlined_call_operand.vmem [shape: f32[1,128], index: 6, kind: input, shape index: {}]   ;;  %s770_s7 = inlined_call_operand.vmem [shape: f32[1,4], index: 7, kind: input, shape index: {}]   ;;  %s771_s8 = inlined_call_operand.vmem [shape: f32[1,4], index: 8, kind: input, shape index: {}]   ;;  %s772_s9 = inlined_call_operand.vmem [shape: f32[8,4], index: 9, kind: output, shape index: {}]  }
   0x1   :  { %15 = vsyncpa [#allocation5], 0  ;;  %s619_s30 = smov [#allocation4]   ;;  %s549_s13 = scalar_lea.hbm %s766_s3, 2048 }
   0x2   :  { %s35_s10 = sshll.u32 %s619_s30, 4  ;;  %p550_p0 = scmp.ne.s32.totalorder %s766_s3, %s549_s13  ;;  %s36_s10 = int_to_ptr.vmem [resolvable:$true] %s35_s10 }
   0x3   :  { %p553_p1 = scmp.lt.u32.totalorder %s549_s13, %s766_s3 }
   0x5   :  { %p555_p2 = pnand %p553_p1, %p550_p0 }
   0x7   :  { %558 = shalt.err (!%p555_p2)
}
   0x8   :  { %s559_s18 = scalar_lea.vmem %s36_s10, 2048  ;;  %p564_p4 = scmp.lt.s32.totalorder %s36_s10, %s36_s10 }
   0x9   :  { %p560_p3 = scmp.ne.s32.totalorder %s36_s10, %s559_s18  ;;  %p565_p5 = scmp.lt.s32.totalorder %s559_s18, %s559_s18 }
   0xb   :  { %p566_p6 = por %p565_p5, %p564_p4 }
   0xd   :  { %p567_p7 = pnand %p566_p6, %p560_p3 }
   0xf   :  { %570 = shalt.err (!%p567_p7)
}
  0x10   :  { %s620_s19 = smov 128   ;;  %s621_s20 = smov 8  }
  0x11   :  { %41 = dma.hbm_to_vmem [thread:$0]  %s766_s3, 2048, %s36_s10, [#allocation5], %s620_s19, %s620_s19, %s621_s20  }
  0x12   :  { %s622_s23 = smov [#allocation2]   ;;  %s623_s25 = smov [#allocation6]  }
  0x13   :  { %s22_s24 = sshll.u32 %s622_s23, 4  ;;  %s49_s26 = sshll.u32 %s623_s25, 4  ;;  %s23_s24 = int_to_ptr.vmem [resolvable:$true] %s22_s24  ;;  %s50_s26 = int_to_ptr.vmem [resolvable:$true] %s49_s26 }
  0x14   :  { %s571_s29 = scalar_lea.hbm %s763_s0, 128 }
  0x15   :  { %p572_p8 = scmp.ne.s32.totalorder %s763_s0, %s571_s29  ;;  %p575_p9 = scmp.lt.u32.totalorder %s571_s29, %s763_s0 }
  0x17   :  { %p577_p10 = pnand %p575_p9, %p572_p8 }
  0x19   :  { %580 = shalt.err (!%p577_p10)
}
  0x1a   :  { %s581_s3 = scalar_lea.vmem %s23_s24, 128  ;;  %p586_p12 = scmp.lt.s32.totalorder %s23_s24, %s23_s24 }
  0x1b   :  { %p582_p11 = scmp.ne.s32.totalorder %s23_s24, %s581_s3  ;;  %p587_p13 = scmp.lt.s32.totalorder %s581_s3, %s581_s3 }
  0x1d   :  { %p588_p0 = por %p587_p13, %p586_p12 }
  0x1f   :  { %p589_p1 = pnand %p588_p0, %p582_p11 }
  0x21   :  { %592 = shalt.err (!%p589_p1)
}
  0x22   :  { %25 = dma.hbm_to_vmem [thread:$0]  %s763_s0, 128, %s23_s24, [#allocation3]  }
  0x23   :  { %s593_s17 = scalar_lea.hbm %s768_s5, 2048 }
  0x24   :  { %p594_p2 = scmp.ne.s32.totalorder %s768_s5, %s593_s17  ;;  %p597_p3 = scmp.lt.u32.totalorder %s593_s17, %s768_s5 }
  0x26   :  { %p599_p4 = pnand %p597_p3, %p594_p2 }
  0x28   :  { %602 = shalt.err (!%p599_p4)
}
  0x29   :  { %s603_s25 = scalar_lea.vmem %s50_s26, 2048  ;;  %p608_p6 = scmp.lt.s32.totalorder %s50_s26, %s50_s26 }
  0x2a   :  { %p604_p5 = scmp.ne.s32.totalorder %s50_s26, %s603_s25  ;;  %p609_p7 = scmp.lt.s32.totalorder %s603_s25, %s603_s25 }
  0x2c   :  { %p610_p8 = por %p609_p7, %p608_p6 }
  0x2e   :  { %p611_p9 = pnand %p610_p8, %p604_p5 }
  0x30   :  { %614 = shalt.err (!%p611_p9)
}
  0x31   :  { %55 = dma.hbm_to_vmem [thread:$0]  %s768_s5, 2048, %s50_s26, [#allocation5], %s620_s19, %s620_s19, %s621_s20  }
  0x32   :  { %615 = dma.done.wait [#allocation3], 128  }
  0x33   :  { %616 = vsyncadd [#allocation3], 4294967168 }
  0x34   :  { %617 = dma.done.wait [#allocation5], 4096  }
  0x35   :  { %618 = vsyncadd [#allocation5], 4294963200  ;;  %v624_v0 = vmov 0.0|0.0   ;;  %vm625_vm0 = vmmov 0   ;;  %v626_v1 = vmov 0.0   ;;  %v72_v2 = vld [vmem:[%s764_s1] sm:$0xff] }
  0x36   :  { %488 = vmatprep.subr.bf16.mxu0 %v624_v0  ;;  %415 = vmatprep.mubr.msk.f32.mxu0 %vm625_vm0, %v626_v1  ;;  %v73_v3 = vld [vmem:[%s764_s1 + $0x8] sm:$0xff]  ;;  %v156_v5 = vld [vmem:[#allocation4] sm:$0xff]  ;;  %v158_v7 = vld [vmem:[#allocation4 + $0x10] sm:$0xff]  ;;  %vm81_vm1 = vcmask 130048   ;;  %vm360_vm2 = vcmask 31744  }
  0x37   :  { %491 = vmatprep.subr.bf16.mxu1 %v624_v0  ;;  %450 = vmatprep.mubr.msk.f32.mxu1 %vm625_vm0, %v626_v1  ;;  %v489_v4 = vpack.c.bf16 %v73_v3, %v72_v2  ;;  %v157_v6 = vld [vmem:[#allocation4 + $0x8] sm:$0xff]  ;;  %v159_v9 = vld [vmem:[#allocation4 + $0x18] sm:$0xff]  ;;  %v160_v12 = vld [vmem:[#allocation4 + $0x20] sm:$0xff] }
  0x38   :  { %v492_v8 = vpack.c.bf16 %v157_v6, %v156_v5  ;;  %v71_v10 = vld [vmem:[#allocation2] sm:$0xff]  ;;  %v495_v11 = vpack.c.bf16 %v159_v9, %v158_v7  ;;  %v161_v13 = vld [vmem:[#allocation4 + $0x28] sm:$0xff]  ;;  %v162_v15 = vld [vmem:[#allocation4 + $0x30] sm:$0xff] }
  0x39   :  { %490 = vmatpush3.bf16.msra.mxu0 %v489_v4  ;;  %v498_v14 = vpack.c.bf16 %v161_v13, %v160_v12  ;;  %v163_v16 = vld [vmem:[#allocation4 + $0x38] sm:$0xff]  ;;  %v164_v18 = vld [vmem:[#allocation4 + $0x40] sm:$0xff]  ;;  %v165_v19 = vld [vmem:[#allocation4 + $0x48] sm:$0xff] }
  0x3a   :  { %493 = vmatpush3.bf16.msra.mxu1 %v492_v8  ;;  %515 = vmatprep.subr.bf16.mxu0 %v624_v0  ;;  %v501_v17 = vpack.c.bf16 %v163_v16, %v162_v15  ;;  %v504_v20 = vpack.c.bf16 %v165_v19, %v164_v18  ;;  %v166_v21 = vld [vmem:[#allocation4 + $0x50] sm:$0xff]  ;;  %v167_v22 = vld [vmem:[#allocation4 + $0x58] sm:$0xff]  ;;  %v168_v24 = vld [vmem:[#allocation4 + $0x60] sm:$0xff] }
  0x3b   :  { %494 = vmatprep.subr.bf16.mxu1 %v624_v0  ;;  %v507_v23 = vpack.c.bf16 %v167_v22, %v166_v21  ;;  %v169_v25 = vld [vmem:[#allocation4 + $0x68] sm:$0xff]  ;;  %v170_v27 = vld [vmem:[#allocation4 + $0x70] sm:$0xff]  ;;  %v171_v28 = vld [vmem:[#allocation4 + $0x78] sm:$0xff] }
  0x3c   :  { %416 = vmatmul.mubr.msk.f32.vlgmr.msra.gmra.mrb[0].mxu0 %vm81_vm1, %v71_v10  ;;  %v510_v26 = vpack.c.bf16 %v169_v25, %v168_v24  ;;  %v513_v29 = vpack.c.bf16 %v171_v28, %v170_v27  ;;  %v250_v30 = vld [vmem:[#allocation6] sm:$0xff]  ;;  %v251_v31 = vld [vmem:[#allocation6 + $0x8] sm:$0xff]  ;;  %v252_v32 = vld [vmem:[#allocation6 + $0x10] sm:$0xff] }
  0x3d   :  { %485 = vmatprep.mubr.msk.f32.mxu0 %vm625_vm0, %v626_v1  ;;  %v516_v33 = vpack.c.bf16 %v251_v31, %v250_v30  ;;  %v253_v34 = vld [vmem:[#allocation6 + $0x18] sm:$0xff]  ;;  %v254_v36 = vld [vmem:[#allocation6 + $0x20] sm:$0xff]  ;;  %v255_v37 = vld [vmem:[#allocation6 + $0x28] sm:$0xff] }
  0x3e   :  { %496 = vmatpush3.bf16.msra.mxu1 %v495_v11  ;;  %v519_v35 = vpack.c.bf16 %v253_v34, %v252_v32  ;;  %v522_v38 = vpack.c.bf16 %v255_v37, %v254_v36  ;;  %v256_v39 = vld [vmem:[#allocation6 + $0x30] sm:$0xff]  ;;  %v257_v40 = vld [vmem:[#allocation6 + $0x38] sm:$0xff]  ;;  %v258_v42 = vld [vmem:[#allocation6 + $0x40] sm:$0xff] }
  0x3f   :  { %497 = vmatprep.subr.bf16.mxu1 %v624_v0  ;;  %517 = vmatpush3.bf16.msra.mxu0 %v516_v33  ;;  %v525_v41 = vpack.c.bf16 %v257_v40, %v256_v39  ;;  %v259_v43 = vld [vmem:[#allocation6 + $0x48] sm:$0xff]  ;;  %v260_v45 = vld [vmem:[#allocation6 + $0x50] sm:$0xff]  ;;  %v261_v46 = vld [vmem:[#allocation6 + $0x58] sm:$0xff] }
  0x40   :  { %518 = vmatprep.subr.bf16.mxu0 %v624_v0  ;;  %v528_v44 = vpack.c.bf16 %v259_v43, %v258_v42  ;;  %v531_v47 = vpack.c.bf16 %v261_v46, %v260_v45  ;;  %v262_v48 = vld [vmem:[#allocation6 + $0x60] sm:$0xff]  ;;  %v263_v49 = vld [vmem:[#allocation6 + $0x68] sm:$0xff]  ;;  %v264_v56 = vld [vmem:[#allocation6 + $0x70] sm:$0xff] }
  0x41   :  { %v534_v50 = vpack.c.bf16 %v263_v49, %v262_v48  ;;  %v368_v51 = vld [vmem:[%s765_s2] ss:$0 sm:$0xff]  ;;  %v265_v57 = vld [vmem:[#allocation6 + $0x78] sm:$0xff] }
  0x42   :  { %499 = vmatpush3.bf16.msra.mxu1 %v498_v14  ;;  %v537_v58 = vpack.c.bf16 %v265_v57, %v264_v56  ;;  %v370_v59 = vld [vmem:[%s767_s4] ss:$0 sm:$0xff] }
  0x43   :  { %500 = vmatprep.subr.bf16.mxu1 %v624_v0  ;;  %520 = vmatpush3.bf16.msra.mxu0 %v519_v35  ;;  %v372_v4 = vld [vmem:[%s770_s7] ss:$0 sm:$0xff] }
  0x44   :  { %521 = vmatprep.subr.bf16.mxu0 %v624_v0  ;;  %v373_v6 = vld [vmem:[%s771_s8] ss:$0 sm:$0xff] }
  0x46   :  { %502 = vmatpush3.bf16.msra.mxu1 %v501_v17 }
  0x47   :  { %503 = vmatprep.subr.bf16.mxu1 %v624_v0  ;;  %523 = vmatpush3.bf16.msra.mxu0 %v522_v38 }
  0x48   :  { %524 = vmatprep.subr.bf16.mxu0 %v624_v0 }
  0x4a   :  { %505 = vmatpush3.bf16.msra.mxu1 %v504_v20 }
  0x4b   :  { %506 = vmatprep.subr.bf16.mxu1 %v624_v0  ;;  %526 = vmatpush3.bf16.msra.mxu0 %v525_v41 }
  0x4c   :  { %527 = vmatprep.subr.bf16.mxu0 %v624_v0 }
  0x4e   :  { %508 = vmatpush3.bf16.msra.mxu1 %v507_v23 }
  0x4f   :  { %509 = vmatprep.subr.bf16.mxu1 %v624_v0  ;;  %529 = vmatpush3.bf16.msra.mxu0 %v528_v44 }
  0x50   :  { %530 = vmatprep.subr.bf16.mxu0 %v624_v0 }
  0x52   :  { %511 = vmatpush3.bf16.msra.mxu1 %v510_v26 }
  0x53   :  { %512 = vmatprep.subr.bf16.mxu1 %v624_v0  ;;  %532 = vmatpush3.bf16.msra.mxu0 %v531_v47 }
  0x54   :  { %533 = vmatprep.subr.bf16.mxu0 %v624_v0 }
  0x56   :  { %514 = vmatpush3.bf16.msra.mxu1 %v513_v29 }
  0x57   :  { %535 = vmatpush3.bf16.msra.mxu0 %v534_v50 }
  0x58   :  { %536 = vmatprep.subr.bf16.mxu0 %v624_v0  ;;  %v371_v0 = vld [vmem:[%s769_s6] ss:$0 sm:$0xff] }
  0x5b   :  { %538 = vmatpush3.bf16.msra.mxu0 %v537_v58 }
 0x10f   :  { %v151_v52 = vpop.f32.mrb[0].mxu0 }
 0x110   :  { %v152_v53 = vadd.f32 %v368_v51, %v151_v52  ;;  %v417_v54 = vpop.f32.mrb[1].mxu0 }
 0x112   :  { %v155_v55 = vmax.f32 %v152_v53, 0.0 }
 0x114   :  { %451 = vmatmul.mubr.f32.vlgmr.msra.gmra.mrb[0].mxu1 %v155_v55 }
 0x1e7   :  { %v245_v60 = vpop.f32.mrb[0].mxu1 }
 0x1e8   :  { %v246_v61 = vadd.f32 %v370_v59, %v245_v60  ;;  %v452_v62 = vpop.f32.mrb[1].mxu1 }
 0x1ea   :  { %v249_v63 = vmax.f32 %v246_v61, 0.0 }
 0x1ec   :  { %486 = vmatmul.mubr.f32.vlgmr.msra.gmra.mrb[2].mxu0 %v249_v63 }
 0x2bf   :  { %v339_v1 = vpop.f32.mrb[2].mxu0 }
 0x2c0   :  { %v340_v2 = vadd.f32 %v371_v0, %v339_v1  ;;  %v487_v3 = vpop.f32.mrb[3].mxu0 }
 0x2c2   :  { %547 = vtanh.f32 %v340_v2 }
 0x2cc   :  { %v548_v5 = vpop.eup %547 }
 0x2cd   :  { %v351_v7 = vmul.f32 %v548_v5, %v372_v4 }
 0x2cf   :  { %v359_v8 = vadd.f32 %v373_v6, %v351_v7 }
 0x2d1   :  { %361 = vst.msk [vmem:[%s772_s9] sm:$0xff] %vm360_vm2, %v359_v8 }
 0x2d2   :  { %366 = vsyncpa [#allocation3], 1 }
 0x2d3   :  { %367 = vsyncpa [#allocation5], 1 }

</bundles_post_ra>
